<compile_context>
chip_gen: v5e
topology: v5e:2x2
jax: 0.10.0
libtpu: 0.0.40
codegen_flags: <defaults>
</compile_context>

<pallas_src>
import jax
import jax.numpy as jnp
from jax import lax
from jax.experimental import pallas as pl
from jax.experimental.pallas import tpu as pltpu

HIDDEN_SIZE = 2
INPUT_SIZE = 5
NUM_LAYER = 1
FC1_SIZE = 128

_H = HIDDEN_SIZE
_I = INPUT_SIZE
_G = 4 * _H

# Packed parameter slab layout (rows of a (32, 128) f32 slab; one lane-dense DMA).
_ROW_W_IH = 0               # (4H, I)   rows  0:8,  cols 0:5   lstm.weight_ih_l0
_ROW_W_HH = _G              # (4H, H)   rows  8:16, cols 0:2   lstm.weight_hh_l0
_ROW_B = 2 * _G             # (4H, 1)   rows 16:24, col 0      b_ih + b_hh
_ROW_FC1W = 3 * _G          # (H, 128)  rows 24:26             fc_1.weight^T
_ROW_FC1B = 3 * _G + _H     # (1, 128)  row  26                fc_1.bias
_ROW_FCW = _ROW_FC1B + 1    # (1, 128)  row  27                fc.weight
_ROW_FCB = _ROW_FCW + 1     # (1, 1)    row  28, col 0         fc.bias
_SLAB_ROWS = 32


def _lstm_head_kernel(x_ref, p_ref, out_ref):
    """Whole forward pass; gate-major recurrence (gates on sublanes, batch on lanes).

    x_ref:   (I, T*B)   feature-major input, column index = t*B + b
    p_ref:   (32, 128)  packed parameter slab (see _ROW_* layout above)
    out_ref: (B, 1)
    """
    B = out_ref.shape[0]
    T = x_ref.shape[1] // B

    # --- Carve parameters out of the packed slab (loop-invariant, lane offset 0). ---
    w_ih = p_ref[_ROW_W_IH:_ROW_W_IH + _G, 0:_I]          # (4H, I)
    w_hh = p_ref[_ROW_W_HH:_ROW_W_HH + _G, 0:_H]          # (4H, H)
    b_col = p_ref[_ROW_B:_ROW_B + _G, 0:1]                # (4H, 1)
    fc1_w_t = p_ref[_ROW_FC1W:_ROW_FC1W + _H, :]          # (H, 128)
    fc1_b = p_ref[_ROW_FC1B:_ROW_FC1B + 1, :]             # (1, 128)
    fc_w = p_ref[_ROW_FCW:_ROW_FCW + 1, :]                # (1, 128)
    fc_b = p_ref[_ROW_FCB:_ROW_FCB + 1, 0:1]              # (1, 1)

    # --- Fused input projection: ONE MXU matmul for all T steps, bias folded once. ---
    gx_all = jnp.dot(w_ih, x_ref[...],
                     preferred_element_type=jnp.float32) + b_col      # (4H, T*B)
    # Per-step blocks: cheap value slices, independent of h/c -> off the serial chain.
    gxs = [gx_all[:, t * B:(t + 1) * B] for t in range(T)]            # T x (4H, B)

    # --- Loop-invariant hoists. ---
    # Recurrent weight columns, pre-broadcast over the batch lanes (hoisted).
    w_cols = [jnp.broadcast_to(w_hh[:, j:j + 1], (_G, B)) for j in range(_H)]
    # Single-tanh gate trick: sigmoid(x) = 0.5*tanh(0.5*x) + 0.5 on the i/f/o rows,
    # plain tanh on the g rows -> ONE EUP pass per step over the whole gates block.
    row = lax.broadcasted_iota(jnp.int32, (_G, B), 0)
    is_g = (row >= 2 * _H) & (row < 3 * _H)
    scale = jnp.where(is_g, 1.0, 0.5).astype(jnp.float32)   # pre- and post-scale
    offset = jnp.where(is_g, 0.0, 0.5).astype(jnp.float32)

    h = jnp.zeros((_H, B), jnp.float32)   # vreg-resident carries, gate-major
    c = jnp.zeros((_H, B), jnp.float32)

    # --- Recurrence: fully unrolled (T is small and static). ---
    for t in range(T):
        gates = gxs[t]                                        # (4H, B)
        for j in range(_H):
            # Recurrent MAC: the only loop-carried broadcast is the sublane
            # broadcast of a single h row (weight broadcasts are hoisted).
            gates = gates + w_cols[j] * h[j:j + 1, :]
        act = jnp.tanh(gates * scale) * scale + offset        # one EUP pass
        i_g = act[0:_H, :]                                    # sigmoid(i)
        f_g = act[_H:2 * _H, :]                               # sigmoid(f)
        g_g = act[2 * _H:3 * _H, :]                           # tanh(g)
        o_g = act[3 * _H:4 * _H, :]                           # sigmoid(o)
        c = f_g * c + i_g * g_g
        h = o_g * jnp.tanh(c)                                 # second (unavoidable) EUP op

    # --- Head: relu -> fc_1 -> relu -> fc. ---
    h_relu = jnp.maximum(h, 0.0)                              # (H, B), gate-major
    # Contract the H (sublane) axis of both operands -> lane-dense (B, 128) output.
    y1 = lax.dot_general(h_relu, fc1_w_t,
                         dimension_numbers=(((0,), (0,)), ((), ())),
                         preferred_element_type=jnp.float32) + fc1_b
    y1 = jnp.maximum(y1, 0.0)                                 # (B, 128)
    # Linear(128 -> 1) as VPU multiply + lane reduce (no degenerate (128,1) matmul).
    y = jnp.sum(y1 * fc_w, axis=-1, keepdims=True) + fc_b     # (B, 1)
    out_ref[...] = y.astype(out_ref.dtype)


def pack_params(params):
    """One-time layout plumbing: pack all parameters into a (32, 128) f32 slab."""
    f32 = jnp.float32
    p = jnp.zeros((_SLAB_ROWS, 128), f32)
    p = p.at[_ROW_W_IH:_ROW_W_IH + _G, 0:_I].set(params["w_ih"].astype(f32))
    p = p.at[_ROW_W_HH:_ROW_W_HH + _G, 0:_H].set(params["w_hh"].astype(f32))
    b_col = (params["b_ih"] + params["b_hh"]).astype(f32).reshape(_G, 1)
    p = p.at[_ROW_B:_ROW_B + _G, 0:1].set(b_col)
    p = p.at[_ROW_FC1W:_ROW_FC1W + _H, :].set(params["fc1_w"].T.astype(f32))
    p = p.at[_ROW_FC1B, :].set(params["fc1_b"].astype(f32))
    p = p.at[_ROW_FCW, :].set(params["fc_w"].reshape(-1).astype(f32))
    p = p.at[_ROW_FCB, 0].set(params["fc_b"].astype(f32)[0])
    return p


@jax.jit
def lstm_forward(x, param_slab):
    """x: (B, T, INPUT_SIZE) float32, batch_first like the PyTorch module."""
    B, T, I = x.shape
    # Feature-major, time-then-batch columns: x_gm[i, t*B + b] = x[b, t, i].
    x_gm = jnp.transpose(x, (2, 1, 0)).reshape(I, T * B).astype(jnp.float32)

    vmem = pl.BlockSpec(memory_space=pltpu.MemorySpace.VMEM)
    # Single ungridded call: total footprint is a few KB, so no grid / tiling
    # (each grid step would add fixed overhead exceeding the whole kernel).
    return pl.pallas_call(
        _lstm_head_kernel,
        out_shape=jax.ShapeDtypeStruct((B, 1), jnp.float32),
        in_specs=[vmem, vmem],
        out_specs=vmem,
    )(x_gm, param_slab)


def init_params(key):
    """Deterministic parameter init (PyTorch-style uniform ranges)."""
    H, I = HIDDEN_SIZE, INPUT_SIZE
    ks = jax.random.split(key, 8)
    k_lstm = 1.0 / jnp.sqrt(H)
    k_fc1 = 1.0 / jnp.sqrt(H)
    k_fc = 1.0 / jnp.sqrt(128.0)
    u = lambda k, shape, lim: jax.random.uniform(
        k, shape, jnp.float32, minval=-lim, maxval=lim)
    return {
        "w_ih": u(ks[0], (4 * H, I), k_lstm),
        "w_hh": u(ks[1], (4 * H, H), k_lstm),
        "b_ih": u(ks[2], (4 * H,), k_lstm),
        "b_hh": u(ks[3], (4 * H,), k_lstm),
        "fc1_w": u(ks[4], (128, H), k_fc1),
        "fc1_b": u(ks[5], (128,), k_fc1),
        "fc_w": u(ks[6], (1, 128), k_fc),
        "fc_b": u(ks[7], (1,), k_fc),
    }


def lstm_forward_ref(x, params):
    """Pure-JAX reference for correctness checking."""
    H = HIDDEN_SIZE
    B, T, I = x.shape
    h = jnp.zeros((B, H), jnp.float32)
    c = jnp.zeros((B, H), jnp.float32)
    b = params["b_ih"] + params["b_hh"]
    for t in range(T):
        gates = x[:, t, :] @ params["w_ih"].T + h @ params["w_hh"].T + b
        i_g = jax.nn.sigmoid(gates[:, 0:H])
        f_g = jax.nn.sigmoid(gates[:, H:2 * H])
        g_g = jnp.tanh(gates[:, 2 * H:3 * H])
        o_g = jax.nn.sigmoid(gates[:, 3 * H:4 * H])
        c = f_g * c + i_g * g_g
        h = o_g * jnp.tanh(c)
    out = jnp.maximum(h, 0.0)
    out = jnp.maximum(out @ params["fc1_w"].T + params["fc1_b"], 0.0)
    return out @ params["fc_w"].T + params["fc_b"]


if __name__ == "__main__":
    key = jax.random.PRNGKey(0)
    k_param, k_x = jax.random.split(key)

    batch, seq_length = 2, 8
    params = init_params(k_param)
    x = jax.random.normal(k_x, (batch, seq_length, INPUT_SIZE), jnp.float32)

    param_slab = pack_params(params)   # built once, outside the hot path

    y = lstm_forward(x, param_slab)
    jax.block_until_ready(y)

    y_ref = lstm_forward_ref(x, params)
    assert y.shape == (batch, 1)
    assert jnp.allclose(y, y_ref, atol=1e-5, rtol=1e-5), (y, y_ref)

    print("KERNEL_OK")
</pallas_src>

<mosaic_0001>
module attributes {stable_mosaic.version = 11 : i64} {
  func.func @_lstm_head_kernel(%arg0: memref<5x16xf32, #tpu.memory_space<vmem>>, %arg1: memref<32x128xf32, #tpu.memory_space<vmem>>, %arg2: memref<2x1xf32, #tpu.memory_space<vmem>>) attributes {dimension_semantics = [], scalar_prefetch = 0 : i64, scratch_operands = 0 : i64, tpu.core_type = #tpu.core_type<tc>} {
    %c0 = arith.constant 0 : index
    %c0_0 = arith.constant 0 : index
    %0 = vector.load %arg1[%c0, %c0_0] : memref<32x128xf32, #tpu.memory_space<vmem>>, vector<8x5xf32>
    %c8 = arith.constant 8 : index
    %c0_1 = arith.constant 0 : index
    %1 = vector.load %arg1[%c8, %c0_1] : memref<32x128xf32, #tpu.memory_space<vmem>>, vector<8x2xf32>
    %c16 = arith.constant 16 : index
    %c0_2 = arith.constant 0 : index
    %2 = vector.load %arg1[%c16, %c0_2] : memref<32x128xf32, #tpu.memory_space<vmem>>, vector<8x1xf32>
    %c24 = arith.constant 24 : index
    %c0_3 = arith.constant 0 : index
    %3 = vector.load %arg1[%c24, %c0_3] : memref<32x128xf32, #tpu.memory_space<vmem>>, vector<2x128xf32>
    %c26 = arith.constant 26 : index
    %c0_4 = arith.constant 0 : index
    %4 = vector.load %arg1[%c26, %c0_4] : memref<32x128xf32, #tpu.memory_space<vmem>>, vector<1x128xf32>
    %c27 = arith.constant 27 : index
    %c0_5 = arith.constant 0 : index
    %5 = vector.load %arg1[%c27, %c0_5] : memref<32x128xf32, #tpu.memory_space<vmem>>, vector<1x128xf32>
    %c28 = arith.constant 28 : index
    %c0_6 = arith.constant 0 : index
    %6 = vector.load %arg1[%c28, %c0_6] : memref<32x128xf32, #tpu.memory_space<vmem>>, vector<1x1xf32>
    %c0_7 = arith.constant 0 : index
    %c0_8 = arith.constant 0 : index
    %7 = vector.load %arg0[%c0_7, %c0_8] : memref<5x16xf32, #tpu.memory_space<vmem>>, vector<5x16xf32>
    %cst = arith.constant dense<0.000000e+00> : vector<8x16xf32>
    %8 = tpu.matmul %0, %7, %cst {dimension_numbers = #tpu.dot_dimension_numbers<[1], [0], [0], [1], [0, 0, 1, 1], [], []>} : vector<8x5xf32>, vector<5x16xf32>, vector<8x16xf32> -> vector<8x16xf32>
    %9 = vector.broadcast %2 : vector<8x1xf32> to vector<8x16xf32>
    %10 = arith.addf %8, %9 : vector<8x16xf32>
    %11 = vector.extract_strided_slice %10 {offsets = [0, 0], sizes = [8, 2], strides = [1, 1]} : vector<8x16xf32> to vector<8x2xf32>
    %12 = vector.extract_strided_slice %10 {offsets = [0, 2], sizes = [8, 2], strides = [1, 1]} : vector<8x16xf32> to vector<8x2xf32>
    %13 = vector.extract_strided_slice %10 {offsets = [0, 4], sizes = [8, 2], strides = [1, 1]} : vector<8x16xf32> to vector<8x2xf32>
    %14 = vector.extract_strided_slice %10 {offsets = [0, 6], sizes = [8, 2], strides = [1, 1]} : vector<8x16xf32> to vector<8x2xf32>
    %15 = vector.extract_strided_slice %10 {offsets = [0, 8], sizes = [8, 2], strides = [1, 1]} : vector<8x16xf32> to vector<8x2xf32>
    %16 = vector.extract_strided_slice %10 {offsets = [0, 10], sizes = [8, 2], strides = [1, 1]} : vector<8x16xf32> to vector<8x2xf32>
    %17 = vector.extract_strided_slice %10 {offsets = [0, 12], sizes = [8, 2], strides = [1, 1]} : vector<8x16xf32> to vector<8x2xf32>
    %18 = vector.extract_strided_slice %10 {offsets = [0, 14], sizes = [8, 2], strides = [1, 1]} : vector<8x16xf32> to vector<8x2xf32>
    %19 = vector.extract_strided_slice %1 {offsets = [0, 0], sizes = [8, 1], strides = [1, 1]} : vector<8x2xf32> to vector<8x1xf32>
    %20 = vector.shape_cast %19 : vector<8x1xf32> to vector<8x1xf32>
    %21 = vector.broadcast %20 : vector<8x1xf32> to vector<8x2xf32>
    %22 = vector.extract_strided_slice %1 {offsets = [0, 1], sizes = [8, 1], strides = [1, 1]} : vector<8x2xf32> to vector<8x1xf32>
    %23 = vector.shape_cast %22 : vector<8x1xf32> to vector<8x1xf32>
    %24 = vector.broadcast %23 : vector<8x1xf32> to vector<8x2xf32>
    %25 = tpu.iota {dimensions = array<i32: 0>} : vector<8x2xi32>
    %c4_i32 = arith.constant 4 : i32
    %26 = vector.broadcast %c4_i32 : i32 to vector<8x2xi32>
    %27 = arith.cmpi sge, %25, %26 : vector<8x2xi32>
    %c6_i32 = arith.constant 6 : i32
    %28 = vector.broadcast %c6_i32 : i32 to vector<8x2xi32>
    %29 = arith.cmpi slt, %25, %28 : vector<8x2xi32>
    %30 = arith.andi %27, %29 : vector<8x2xi1>
    %cst_9 = arith.constant 1.000000e+00 : f32
    %cst_10 = arith.constant 5.000000e-01 : f32
    %31 = vector.broadcast %cst_9 : f32 to vector<8x2xf32>
    %32 = vector.broadcast %cst_10 : f32 to vector<8x2xf32>
    %33 = arith.select %30, %31, %32 : vector<8x2xi1>, vector<8x2xf32>
    %cst_11 = arith.constant 0.000000e+00 : f32
    %cst_12 = arith.constant 5.000000e-01 : f32
    %34 = vector.broadcast %cst_11 : f32 to vector<8x2xf32>
    %35 = vector.broadcast %cst_12 : f32 to vector<8x2xf32>
    %36 = arith.select %30, %34, %35 : vector<8x2xi1>, vector<8x2xf32>
    %cst_13 = arith.constant 0.000000e+00 : f32
    %37 = vector.broadcast %cst_13 : f32 to vector<2x2xf32>
    %cst_14 = arith.constant 0.000000e+00 : f32
    %38 = vector.broadcast %cst_14 : f32 to vector<2x2xf32>
    %39 = vector.extract_strided_slice %37 {offsets = [0, 0], sizes = [1, 2], strides = [1, 1]} : vector<2x2xf32> to vector<1x2xf32>
    %40 = vector.broadcast %39 : vector<1x2xf32> to vector<8x2xf32>
    %41 = arith.mulf %21, %40 : vector<8x2xf32>
    %42 = arith.addf %11, %41 : vector<8x2xf32>
    %43 = vector.extract_strided_slice %37 {offsets = [1, 0], sizes = [1, 2], strides = [1, 1]} : vector<2x2xf32> to vector<1x2xf32>
    %44 = vector.broadcast %43 : vector<1x2xf32> to vector<8x2xf32>
    %45 = arith.mulf %24, %44 : vector<8x2xf32>
    %46 = arith.addf %42, %45 : vector<8x2xf32>
    %47 = arith.mulf %46, %33 : vector<8x2xf32>
    %48 = math.tanh %47 : vector<8x2xf32>
    %49 = arith.mulf %48, %33 : vector<8x2xf32>
    %50 = arith.addf %49, %36 : vector<8x2xf32>
    %51 = vector.extract_strided_slice %50 {offsets = [0, 0], sizes = [2, 2], strides = [1, 1]} : vector<8x2xf32> to vector<2x2xf32>
    %52 = vector.extract_strided_slice %50 {offsets = [2, 0], sizes = [2, 2], strides = [1, 1]} : vector<8x2xf32> to vector<2x2xf32>
    %53 = vector.extract_strided_slice %50 {offsets = [4, 0], sizes = [2, 2], strides = [1, 1]} : vector<8x2xf32> to vector<2x2xf32>
    %54 = vector.extract_strided_slice %50 {offsets = [6, 0], sizes = [2, 2], strides = [1, 1]} : vector<8x2xf32> to vector<2x2xf32>
    %55 = arith.mulf %52, %38 : vector<2x2xf32>
    %56 = arith.mulf %51, %53 : vector<2x2xf32>
    %57 = arith.addf %55, %56 : vector<2x2xf32>
    %58 = math.tanh %57 : vector<2x2xf32>
    %59 = arith.mulf %54, %58 : vector<2x2xf32>
    %60 = vector.extract_strided_slice %59 {offsets = [0, 0], sizes = [1, 2], strides = [1, 1]} : vector<2x2xf32> to vector<1x2xf32>
    %61 = vector.broadcast %60 : vector<1x2xf32> to vector<8x2xf32>
    %62 = arith.mulf %21, %61 : vector<8x2xf32>
    %63 = arith.addf %12, %62 : vector<8x2xf32>
    %64 = vector.extract_strided_slice %59 {offsets = [1, 0], sizes = [1, 2], strides = [1, 1]} : vector<2x2xf32> to vector<1x2xf32>
    %65 = vector.broadcast %64 : vector<1x2xf32> to vector<8x2xf32>
    %66 = arith.mulf %24, %65 : vector<8x2xf32>
    %67 = arith.addf %63, %66 : vector<8x2xf32>
    %68 = arith.mulf %67, %33 : vector<8x2xf32>
    %69 = math.tanh %68 : vector<8x2xf32>
    %70 = arith.mulf %69, %33 : vector<8x2xf32>
    %71 = arith.addf %70, %36 : vector<8x2xf32>
    %72 = vector.extract_strided_slice %71 {offsets = [0, 0], sizes = [2, 2], strides = [1, 1]} : vector<8x2xf32> to vector<2x2xf32>
    %73 = vector.extract_strided_slice %71 {offsets = [2, 0], sizes = [2, 2], strides = [1, 1]} : vector<8x2xf32> to vector<2x2xf32>
    %74 = vector.extract_strided_slice %71 {offsets = [4, 0], sizes = [2, 2], strides = [1, 1]} : vector<8x2xf32> to vector<2x2xf32>
    %75 = vector.extract_strided_slice %71 {offsets = [6, 0], sizes = [2, 2], strides = [1, 1]} : vector<8x2xf32> to vector<2x2xf32>
    %76 = arith.mulf %73, %57 : vector<2x2xf32>
    %77 = arith.mulf %72, %74 : vector<2x2xf32>
    %78 = arith.addf %76, %77 : vector<2x2xf32>
    %79 = math.tanh %78 : vector<2x2xf32>
    %80 = arith.mulf %75, %79 : vector<2x2xf32>
    %81 = vector.extract_strided_slice %80 {offsets = [0, 0], sizes = [1, 2], strides = [1, 1]} : vector<2x2xf32> to vector<1x2xf32>
    %82 = vector.broadcast %81 : vector<1x2xf32> to vector<8x2xf32>
    %83 = arith.mulf %21, %82 : vector<8x2xf32>
    %84 = arith.addf %13, %83 : vector<8x2xf32>
    %85 = vector.extract_strided_slice %80 {offsets = [1, 0], sizes = [1, 2], strides = [1, 1]} : vector<2x2xf32> to vector<1x2xf32>
    %86 = vector.broadcast %85 : vector<1x2xf32> to vector<8x2xf32>
    %87 = arith.mulf %24, %86 : vector<8x2xf32>
    %88 = arith.addf %84, %87 : vector<8x2xf32>
    %89 = arith.mulf %88, %33 : vector<8x2xf32>
    %90 = math.tanh %89 : vector<8x2xf32>
    %91 = arith.mulf %90, %33 : vector<8x2xf32>
    %92 = arith.addf %91, %36 : vector<8x2xf32>
    %93 = vector.extract_strided_slice %92 {offsets = [0, 0], sizes = [2, 2], strides = [1, 1]} : vector<8x2xf32> to vector<2x2xf32>
    %94 = vector.extract_strided_slice %92 {offsets = [2, 0], sizes = [2, 2], strides = [1, 1]} : vector<8x2xf32> to vector<2x2xf32>
    %95 = vector.extract_strided_slice %92 {offsets = [4, 0], sizes = [2, 2], strides = [1, 1]} : vector<8x2xf32> to vector<2x2xf32>
    %96 = vector.extract_strided_slice %92 {offsets = [6, 0], sizes = [2, 2], strides = [1, 1]} : vector<8x2xf32> to vector<2x2xf32>
    %97 = arith.mulf %94, %78 : vector<2x2xf32>
    %98 = arith.mulf %93, %95 : vector<2x2xf32>
    %99 = arith.addf %97, %98 : vector<2x2xf32>
    %100 = math.tanh %99 : vector<2x2xf32>
    %101 = arith.mulf %96, %100 : vector<2x2xf32>
    %102 = vector.extract_strided_slice %101 {offsets = [0, 0], sizes = [1, 2], strides = [1, 1]} : vector<2x2xf32> to vector<1x2xf32>
    %103 = vector.broadcast %102 : vector<1x2xf32> to vector<8x2xf32>
    %104 = arith.mulf %21, %103 : vector<8x2xf32>
    %105 = arith.addf %14, %104 : vector<8x2xf32>
    %106 = vector.extract_strided_slice %101 {offsets = [1, 0], sizes = [1, 2], strides = [1, 1]} : vector<2x2xf32> to vector<1x2xf32>
    %107 = vector.broadcast %106 : vector<1x2xf32> to vector<8x2xf32>
    %108 = arith.mulf %24, %107 : vector<8x2xf32>
    %109 = arith.addf %105, %108 : vector<8x2xf32>
    %110 = arith.mulf %109, %33 : vector<8x2xf32>
    %111 = math.tanh %110 : vector<8x2xf32>
    %112 = arith.mulf %111, %33 : vector<8x2xf32>
    %113 = arith.addf %112, %36 : vector<8x2xf32>
    %114 = vector.extract_strided_slice %113 {offsets = [0, 0], sizes = [2, 2], strides = [1, 1]} : vector<8x2xf32> to vector<2x2xf32>
    %115 = vector.extract_strided_slice %113 {offsets = [2, 0], sizes = [2, 2], strides = [1, 1]} : vector<8x2xf32> to vector<2x2xf32>
    %116 = vector.extract_strided_slice %113 {offsets = [4, 0], sizes = [2, 2], strides = [1, 1]} : vector<8x2xf32> to vector<2x2xf32>
    %117 = vector.extract_strided_slice %113 {offsets = [6, 0], sizes = [2, 2], strides = [1, 1]} : vector<8x2xf32> to vector<2x2xf32>
    %118 = arith.mulf %115, %99 : vector<2x2xf32>
    %119 = arith.mulf %114, %116 : vector<2x2xf32>
    %120 = arith.addf %118, %119 : vector<2x2xf32>
    %121 = math.tanh %120 : vector<2x2xf32>
    %122 = arith.mulf %117, %121 : vector<2x2xf32>
    %123 = vector.extract_strided_slice %122 {offsets = [0, 0], sizes = [1, 2], strides = [1, 1]} : vector<2x2xf32> to vector<1x2xf32>
    %124 = vector.broadcast %123 : vector<1x2xf32> to vector<8x2xf32>
    %125 = arith.mulf %21, %124 : vector<8x2xf32>
    %126 = arith.addf %15, %125 : vector<8x2xf32>
    %127 = vector.extract_strided_slice %122 {offsets = [1, 0], sizes = [1, 2], strides = [1, 1]} : vector<2x2xf32> to vector<1x2xf32>
    %128 = vector.broadcast %127 : vector<1x2xf32> to vector<8x2xf32>
    %129 = arith.mulf %24, %128 : vector<8x2xf32>
    %130 = arith.addf %126, %129 : vector<8x2xf32>
    %131 = arith.mulf %130, %33 : vector<8x2xf32>
    %132 = math.tanh %131 : vector<8x2xf32>
    %133 = arith.mulf %132, %33 : vector<8x2xf32>
    %134 = arith.addf %133, %36 : vector<8x2xf32>
    %135 = vector.extract_strided_slice %134 {offsets = [0, 0], sizes = [2, 2], strides = [1, 1]} : vector<8x2xf32> to vector<2x2xf32>
    %136 = vector.extract_strided_slice %134 {offsets = [2, 0], sizes = [2, 2], strides = [1, 1]} : vector<8x2xf32> to vector<2x2xf32>
    %137 = vector.extract_strided_slice %134 {offsets = [4, 0], sizes = [2, 2], strides = [1, 1]} : vector<8x2xf32> to vector<2x2xf32>
    %138 = vector.extract_strided_slice %134 {offsets = [6, 0], sizes = [2, 2], strides = [1, 1]} : vector<8x2xf32> to vector<2x2xf32>
    %139 = arith.mulf %136, %120 : vector<2x2xf32>
    %140 = arith.mulf %135, %137 : vector<2x2xf32>
    %141 = arith.addf %139, %140 : vector<2x2xf32>
    %142 = math.tanh %141 : vector<2x2xf32>
    %143 = arith.mulf %138, %142 : vector<2x2xf32>
    %144 = vector.extract_strided_slice %143 {offsets = [0, 0], sizes = [1, 2], strides = [1, 1]} : vector<2x2xf32> to vector<1x2xf32>
    %145 = vector.broadcast %144 : vector<1x2xf32> to vector<8x2xf32>
    %146 = arith.mulf %21, %145 : vector<8x2xf32>
    %147 = arith.addf %16, %146 : vector<8x2xf32>
    %148 = vector.extract_strided_slice %143 {offsets = [1, 0], sizes = [1, 2], strides = [1, 1]} : vector<2x2xf32> to vector<1x2xf32>
    %149 = vector.broadcast %148 : vector<1x2xf32> to vector<8x2xf32>
    %150 = arith.mulf %24, %149 : vector<8x2xf32>
    %151 = arith.addf %147, %150 : vector<8x2xf32>
    %152 = arith.mulf %151, %33 : vector<8x2xf32>
    %153 = math.tanh %152 : vector<8x2xf32>
    %154 = arith.mulf %153, %33 : vector<8x2xf32>
    %155 = arith.addf %154, %36 : vector<8x2xf32>
    %156 = vector.extract_strided_slice %155 {offsets = [0, 0], sizes = [2, 2], strides = [1, 1]} : vector<8x2xf32> to vector<2x2xf32>
    %157 = vector.extract_strided_slice %155 {offsets = [2, 0], sizes = [2, 2], strides = [1, 1]} : vector<8x2xf32> to vector<2x2xf32>
    %158 = vector.extract_strided_slice %155 {offsets = [4, 0], sizes = [2, 2], strides = [1, 1]} : vector<8x2xf32> to vector<2x2xf32>
    %159 = vector.extract_strided_slice %155 {offsets = [6, 0], sizes = [2, 2], strides = [1, 1]} : vector<8x2xf32> to vector<2x2xf32>
    %160 = arith.mulf %157, %141 : vector<2x2xf32>
    %161 = arith.mulf %156, %158 : vector<2x2xf32>
    %162 = arith.addf %160, %161 : vector<2x2xf32>
    %163 = math.tanh %162 : vector<2x2xf32>
    %164 = arith.mulf %159, %163 : vector<2x2xf32>
    %165 = vector.extract_strided_slice %164 {offsets = [0, 0], sizes = [1, 2], strides = [1, 1]} : vector<2x2xf32> to vector<1x2xf32>
    %166 = vector.broadcast %165 : vector<1x2xf32> to vector<8x2xf32>
    %167 = arith.mulf %21, %166 : vector<8x2xf32>
    %168 = arith.addf %17, %167 : vector<8x2xf32>
    %169 = vector.extract_strided_slice %164 {offsets = [1, 0], sizes = [1, 2], strides = [1, 1]} : vector<2x2xf32> to vector<1x2xf32>
    %170 = vector.broadcast %169 : vector<1x2xf32> to vector<8x2xf32>
    %171 = arith.mulf %24, %170 : vector<8x2xf32>
    %172 = arith.addf %168, %171 : vector<8x2xf32>
    %173 = arith.mulf %172, %33 : vector<8x2xf32>
    %174 = math.tanh %173 : vector<8x2xf32>
    %175 = arith.mulf %174, %33 : vector<8x2xf32>
    %176 = arith.addf %175, %36 : vector<8x2xf32>
    %177 = vector.extract_strided_slice %176 {offsets = [0, 0], sizes = [2, 2], strides = [1, 1]} : vector<8x2xf32> to vector<2x2xf32>
    %178 = vector.extract_strided_slice %176 {offsets = [2, 0], sizes = [2, 2], strides = [1, 1]} : vector<8x2xf32> to vector<2x2xf32>
    %179 = vector.extract_strided_slice %176 {offsets = [4, 0], sizes = [2, 2], strides = [1, 1]} : vector<8x2xf32> to vector<2x2xf32>
    %180 = vector.extract_strided_slice %176 {offsets = [6, 0], sizes = [2, 2], strides = [1, 1]} : vector<8x2xf32> to vector<2x2xf32>
    %181 = arith.mulf %178, %162 : vector<2x2xf32>
    %182 = arith.mulf %177, %179 : vector<2x2xf32>
    %183 = arith.addf %181, %182 : vector<2x2xf32>
    %184 = math.tanh %183 : vector<2x2xf32>
    %185 = arith.mulf %180, %184 : vector<2x2xf32>
    %186 = vector.extract_strided_slice %185 {offsets = [0, 0], sizes = [1, 2], strides = [1, 1]} : vector<2x2xf32> to vector<1x2xf32>
    %187 = vector.broadcast %186 : vector<1x2xf32> to vector<8x2xf32>
    %188 = arith.mulf %21, %187 : vector<8x2xf32>
    %189 = arith.addf %18, %188 : vector<8x2xf32>
    %190 = vector.extract_strided_slice %185 {offsets = [1, 0], sizes = [1, 2], strides = [1, 1]} : vector<2x2xf32> to vector<1x2xf32>
    %191 = vector.broadcast %190 : vector<1x2xf32> to vector<8x2xf32>
    %192 = arith.mulf %24, %191 : vector<8x2xf32>
    %193 = arith.addf %189, %192 : vector<8x2xf32>
    %194 = arith.mulf %193, %33 : vector<8x2xf32>
    %195 = math.tanh %194 : vector<8x2xf32>
    %196 = arith.mulf %195, %33 : vector<8x2xf32>
    %197 = arith.addf %196, %36 : vector<8x2xf32>
    %198 = vector.extract_strided_slice %197 {offsets = [0, 0], sizes = [2, 2], strides = [1, 1]} : vector<8x2xf32> to vector<2x2xf32>
    %199 = vector.extract_strided_slice %197 {offsets = [2, 0], sizes = [2, 2], strides = [1, 1]} : vector<8x2xf32> to vector<2x2xf32>
    %200 = vector.extract_strided_slice %197 {offsets = [4, 0], sizes = [2, 2], strides = [1, 1]} : vector<8x2xf32> to vector<2x2xf32>
    %201 = vector.extract_strided_slice %197 {offsets = [6, 0], sizes = [2, 2], strides = [1, 1]} : vector<8x2xf32> to vector<2x2xf32>
    %202 = arith.mulf %199, %183 : vector<2x2xf32>
    %203 = arith.mulf %198, %200 : vector<2x2xf32>
    %204 = arith.addf %202, %203 : vector<2x2xf32>
    %205 = math.tanh %204 : vector<2x2xf32>
    %206 = arith.mulf %201, %205 : vector<2x2xf32>
    %cst_15 = arith.constant 0.000000e+00 : f32
    %207 = vector.broadcast %cst_15 : f32 to vector<2x2xf32>
    %208 = arith.maximumf %206, %207 : vector<2x2xf32>
    %cst_16 = arith.constant dense<0.000000e+00> : vector<2x128xf32>
    %209 = tpu.matmul %208, %3, %cst_16 {dimension_numbers = #tpu.dot_dimension_numbers<[0], [0], [1], [1], [0, 1, 1, 1], [], []>} : vector<2x2xf32>, vector<2x128xf32>, vector<2x128xf32> -> vector<2x128xf32>
    %210 = vector.broadcast %4 : vector<1x128xf32> to vector<2x128xf32>
    %211 = arith.addf %209, %210 : vector<2x128xf32>
    %cst_17 = arith.constant 0.000000e+00 : f32
    %212 = vector.broadcast %cst_17 : f32 to vector<2x128xf32>
    %213 = arith.maximumf %211, %212 : vector<2x128xf32>
    %214 = vector.broadcast %5 : vector<1x128xf32> to vector<2x128xf32>
    %215 = arith.mulf %213, %214 : vector<2x128xf32>
    %cst_18 = arith.constant dense<0.000000e+00> : vector<2xf32>
    %216 = vector.multi_reduction <add>, %215, %cst_18 [1] : vector<2x128xf32> to vector<2xf32>
    %217 = vector.shape_cast %216 : vector<2xf32> to vector<2x1xf32>
    %218 = vector.broadcast %6 : vector<1x1xf32> to vector<2x1xf32>
    %219 = arith.addf %217, %218 : vector<2x1xf32>
    %c0_19 = arith.constant 0 : index
    %c0_20 = arith.constant 0 : index
    %220 = vector.load %arg2[%c0_19, %c0_20] : memref<2x1xf32, #tpu.memory_space<vmem>>, vector<2x1xf32>
    tpu.vector_store %arg2[%c0_19, %c0_20], %219 {strides = array<i32>} : memref<2x1xf32, #tpu.memory_space<vmem>>, vector<2x1xf32>,
    return
  }
}

</mosaic_0001>

<bundles_post_ra>
// kernel: lstm_forward.1
= control target key start
LH: loop header
LB: loop body
LE: loop exit
PB: predicated region body
PF: predicated region fallthrough
CT: control target
= control target key end

     0   :  { %vm28_vm0 = vcmask 1044480   ;;  %vm24_vm1 = vcmask 39936   ;;  %v471_v0 = vmov 0   ;;  %v472_v4 = vmov 1   ;;  %s475_s17 = smov 114   ;;  %s597_s1 = inlined_call_operand.vmem [shape: f32[32,128], index: 1, kind: input, shape index: {}]   ;;  %s598_s0 = inlined_call_operand.vmem [shape: f32[5,16], index: 0, kind: input, shape index: {}]   ;;  %s599_s2 = inlined_call_operand.vmem [shape: f32[2,1], index: 2, kind: output, shape index: {}]  }
   0x1   :  { %433 = vset.pattern.permute.xlu0 %v471_v0  ;;  %v13_v1 = vld [vmem:[%s597_s1 + $0x10] sm:$0xff]  ;;  %v18_v2 = vld [vmem:[%s598_s0] sm:$0x1f]  ;;  %434 = vset.pattern.permute.xlu1 %v472_v4  ;;  %v12_v5 = vld [vmem:[%s597_s1 + $0x8] sm:$0xff]  ;;  %v61_v7 = vlaneseq  ;;  %v473_v16 = vmov 0.5   ;;  %s474_s0 = smov 2  }
   0x2   :  { %v11_v3 = vld [vmem:[%s597_s1] sm:$0xff]  ;;  %21 = vperm.xlu0 %433, %v13_v1   ;;  %423 = vmatpush.msk.msra.mxu0 %vm28_vm0, %v18_v2  ;;  %vm385_vm5 = vcmask 1041408   ;;  %vm381_vm6 = vcmask 15360   ;;  %vm417_vm7 = vcmask 1024  }
   0x3   :  { %424 = vmatmul.msk.f32.vlgmr.msra.gmra.mxu0 %vm24_vm1, %v11_v3  ;;  %58 = vperm.xlu1 %434, %v12_v5   ;;  %v62_v8 = vshrl.u32 %v61_v7, 7 }
   0x5   :  { %vm63_vm2 = vcmp.ge.s32.totalorder %v62_v8, 4  ;;  %vm64_vm3 = vcmp.lt.s32.totalorder %v62_v8, 6 }
   0x6   :  { %vm65_vm4 = vmand %vm63_vm2, %vm64_vm3 }
   0x7   :  { %v512_v17 = vsel %vm65_vm4, 1.0, %v473_v16  ;;  %v515_v21 = vsel %vm65_vm4, 0.0, %v473_v16 }
   0xa   :  { %54 = vperm.xlu0 %433, %v12_v5  }
  0x12   :  { %435 = vset.pattern.permute.xlu0 %v472_v4 }
  0x74   :  { %v22_v6 = vpop.permute.xlu0 %21 }
  0x75   :  { %v505_v10 = vpop.permute.xlu1 %58 }
  0x76   :  { %v70_v14 = vmul.f32 0.0, %v505_v10 }
  0x7c   :  { %v503_v9 = vpop.permute.xlu0 %54 }
  0x7d   :  { %v68_v12 = vmul.f32 0.0, %v503_v9 }
  0x80   :  { %v49_v11 = vpop.f32.mrf.mxu0 }
  0x81   :  { %v508_v13 = vadd.f32 %v49_v11, %v22_v6 }
  0x83   :  { %v69_v15 = vadd.f32 %v68_v12, %v508_v13 }
  0x85   :  { %v71_v18 = vadd.f32 %v70_v14, %v69_v15 }
  0x87   :  { %v72_v19 = vmul.f32 %v71_v18, %v512_v17 }
  0x89   :  { %439 = vtanh.f32 %v72_v19 }
  0x8f   :  { %v440_v20 = vpop.eup %439 }
  0x90   :  { %v74_v22 = vmul.f32 %v440_v20, %v512_v17 }
  0x92   :  { %v75_v23 = vadd.f32 %v74_v22, %v515_v21 }
  0x94   :  { %v78_v24 = vrot.slane %v75_v23, 4  ;;  %v76_v26 = vmul.f32 0.0, %v75_v23 }
  0x96   :  { %v80_v25 = vmul.f32 %v78_v24, %v75_v23 }
  0x98   :  { %v82_v27 = vrot.slane %v80_v25, 6 }
  0x9a   :  { %v84_v28 = vadd.f32 %v82_v27, %v76_v26 }
  0x9c   :  { %441 = vtanh.f32 %v84_v28 }
  0xa2   :  { %v442_v29 = vpop.eup %441 }
  0xa3   :  { %v87_v30 = vrot.slane %v442_v29, 4 }
  0xa5   :  { %v89_v31 = vmul.f32 %v87_v30, %v75_v23 }
  0xa7   :  { %v97_v32 = vperm.slane %v89_v31, 7  ;;  %v90_v33 = vperm.slane %v89_v31, 6 }
  0xa9   :  { %v98_v34 = vmul.f32 %v97_v32, %v505_v10  ;;  %v91_v35 = vmul.f32 %v90_v33, %v503_v9 }
  0xab   :  { %100 = vrot.lane.b32.xlu2 %v98_v34, %s474_s0  ;;  %93 = vrot.lane.b32.xlu1 %v91_v35, %s474_s0 }
  0xb3   :  { %109 = vrot.lane.b32.xlu2 %v84_v28, %s474_s0 }
 0x105   :  { %v101_v38 = vpop.permute.xlu2 %100 }
 0x10d   :  { %v110_v46 = vpop.permute.xlu2 %109 }
 0x11d   :  { %v94_v36 = vpop.permute.xlu1 %93 }
 0x11e   :  { %v96_v37 = vadd.f32 %v94_v36, %v508_v13 }
 0x120   :  { %v103_v39 = vadd.f32 %v101_v38, %v96_v37 }
 0x122   :  { %v104_v40 = vmul.f32 %v103_v39, %v512_v17 }
 0x124   :  { %443 = vtanh.f32 %v104_v40 }
 0x12a   :  { %v444_v41 = vpop.eup %443 }
 0x12b   :  { %v106_v42 = vmul.f32 %v444_v41, %v512_v17 }
 0x12d   :  { %v107_v43 = vadd.f32 %v106_v42, %v515_v21 }
 0x12f   :  { %v114_v44 = vrot.slane %v107_v43, 4  ;;  %v112_v47 = vmul.f32 %v110_v46, %v107_v43 }
 0x131   :  { %v116_v45 = vmul.f32 %v114_v44, %v107_v43 }
 0x133   :  { %v118_v48 = vrot.slane %v116_v45, 6 }
 0x135   :  { %v120_v49 = vadd.f32 %v118_v48, %v112_v47 }
 0x137   :  { %145 = vrot.lane.b32.xlu2 %v120_v49, %s474_s0  ;;  %445 = vtanh.f32 %v120_v49 }
 0x13d   :  { %v446_v50 = vpop.eup %445 }
 0x13e   :  { %v123_v51 = vrot.slane %v446_v50, 4 }
 0x140   :  { %v125_v52 = vmul.f32 %v123_v51, %v107_v43 }
 0x142   :  { %v133_v53 = vperm.slane %v125_v52, 7  ;;  %v126_v54 = vperm.slane %v125_v52, 6 }
 0x144   :  { %v134_v55 = vmul.f32 %v133_v53, %v505_v10  ;;  %v127_v56 = vmul.f32 %v126_v54, %v503_v9 }
 0x146   :  { %136 = vrot.lane.b32.xlu1 %v134_v55, %s474_s0  ;;  %129 = vrot.lane.b32.xlu0 %v127_v56, %s474_s0 }
 0x191   :  { %v146_v3 = vpop.permute.xlu2 %145 }
 0x1b8   :  { %v130_v57 = vpop.permute.xlu0 %129  ;;  %v137_v59 = vpop.permute.xlu1 %136 }
 0x1b9   :  { %v132_v58 = vadd.f32 %v130_v57, %v508_v13 }
 0x1bb   :  { %v139_v60 = vadd.f32 %v137_v59, %v132_v58 }
 0x1bd   :  { %v140_v61 = vmul.f32 %v139_v60, %v512_v17 }
 0x1bf   :  { %447 = vtanh.f32 %v140_v61 }
 0x1c5   :  { %v448_v62 = vpop.eup %447 }
 0x1c6   :  { %v142_v63 = vmul.f32 %v448_v62, %v512_v17 }
 0x1c8   :  { %v143_v0 = vadd.f32 %v142_v63, %v515_v21 }
 0x1ca   :  { %v150_v1 = vrot.slane %v143_v0, 4  ;;  %v148_v4 = vmul.f32 %v146_v3, %v143_v0 }
 0x1cc   :  { %v152_v2 = vmul.f32 %v150_v1, %v143_v0 }
 0x1ce   :  { %v154_v5 = vrot.slane %v152_v2, 6 }
 0x1d0   :  { %v156_v6 = vadd.f32 %v154_v5, %v148_v4 }
 0x1d2   :  { %181 = vrot.lane.b32.xlu2 %v156_v6, %s474_s0  ;;  %449 = vtanh.f32 %v156_v6 }
 0x1d8   :  { %v450_v7 = vpop.eup %449 }
 0x1d9   :  { %v159_v8 = vrot.slane %v450_v7, 4 }
 0x1db   :  { %v161_v11 = vmul.f32 %v159_v8, %v143_v0 }
 0x1dd   :  { %v169_v12 = vperm.slane %v161_v11, 7  ;;  %v162_v14 = vperm.slane %v161_v11, 6 }
 0x1df   :  { %v170_v15 = vmul.f32 %v169_v12, %v505_v10  ;;  %v163_v16 = vmul.f32 %v162_v14, %v503_v9 }
 0x1e1   :  { %172 = vrot.lane.b32.xlu1 %v170_v15, %s474_s0  ;;  %165 = vrot.lane.b32.xlu0 %v163_v16, %s474_s0 }
 0x22c   :  { %v182_v29 = vpop.permute.xlu2 %181 }
 0x253   :  { %v166_v18 = vpop.permute.xlu0 %165  ;;  %v173_v20 = vpop.permute.xlu1 %172 }
 0x254   :  { %v168_v19 = vadd.f32 %v166_v18, %v508_v13 }
 0x256   :  { %v175_v22 = vadd.f32 %v173_v20, %v168_v19 }
 0x258   :  { %v176_v23 = vmul.f32 %v175_v22, %v512_v17 }
 0x25a   :  { %451 = vtanh.f32 %v176_v23 }
 0x260   :  { %v452_v24 = vpop.eup %451 }
 0x261   :  { %v178_v25 = vmul.f32 %v452_v24, %v512_v17 }
 0x263   :  { %v179_v26 = vadd.f32 %v178_v25, %v515_v21 }
 0x265   :  { %v186_v27 = vrot.slane %v179_v26, 4  ;;  %v184_v30 = vmul.f32 %v182_v29, %v179_v26 }
 0x267   :  { %v188_v28 = vmul.f32 %v186_v27, %v179_v26 }
 0x269   :  { %v190_v31 = vrot.slane %v188_v28, 6 }
 0x26b   :  { %v192_v32 = vadd.f32 %v190_v31, %v184_v30 }
 0x26d   :  { %217 = vrot.lane.b32.xlu2 %v192_v32, %s474_s0  ;;  %453 = vtanh.f32 %v192_v32 }
 0x273   :  { %v454_v33 = vpop.eup %453 }
 0x274   :  { %v195_v34 = vrot.slane %v454_v33, 4 }
 0x276   :  { %v197_v35 = vmul.f32 %v195_v34, %v179_v26 }
 0x278   :  { %v205_v36 = vperm.slane %v197_v35, 7  ;;  %v198_v37 = vperm.slane %v197_v35, 6 }
 0x27a   :  { %v206_v38 = vmul.f32 %v205_v36, %v505_v10  ;;  %v199_v39 = vmul.f32 %v198_v37, %v503_v9 }
 0x27c   :  { %208 = vrot.lane.b32.xlu1 %v206_v38, %s474_s0  ;;  %201 = vrot.lane.b32.xlu0 %v199_v39, %s474_s0 }
 0x2c7   :  { %v218_v50 = vpop.permute.xlu2 %217 }
 0x2ee   :  { %v202_v40 = vpop.permute.xlu0 %201  ;;  %v209_v42 = vpop.permute.xlu1 %208 }
 0x2ef   :  { %v204_v41 = vadd.f32 %v202_v40, %v508_v13 }
 0x2f1   :  { %v211_v43 = vadd.f32 %v209_v42, %v204_v41 }
 0x2f3   :  { %v212_v44 = vmul.f32 %v211_v43, %v512_v17 }
 0x2f5   :  { %455 = vtanh.f32 %v212_v44 }
 0x2fb   :  { %v456_v45 = vpop.eup %455 }
 0x2fc   :  { %v214_v46 = vmul.f32 %v456_v45, %v512_v17 }
 0x2fe   :  { %v215_v47 = vadd.f32 %v214_v46, %v515_v21 }
 0x300   :  { %v222_v48 = vrot.slane %v215_v47, 4  ;;  %v220_v51 = vmul.f32 %v218_v50, %v215_v47 }
 0x302   :  { %v224_v49 = vmul.f32 %v222_v48, %v215_v47 }
 0x304   :  { %v226_v52 = vrot.slane %v224_v49, 6 }
 0x306   :  { %v228_v53 = vadd.f32 %v226_v52, %v220_v51 }
 0x308   :  { %253 = vrot.lane.b32.xlu2 %v228_v53, %s474_s0  ;;  %457 = vtanh.f32 %v228_v53 }
 0x30e   :  { %v458_v54 = vpop.eup %457 }
 0x30f   :  { %v231_v55 = vrot.slane %v458_v54, 4 }
 0x311   :  { %v233_v56 = vmul.f32 %v231_v55, %v215_v47 }
 0x313   :  { %v241_v57 = vperm.slane %v233_v56, 7  ;;  %v234_v58 = vperm.slane %v233_v56, 6 }
 0x315   :  { %v242_v59 = vmul.f32 %v241_v57, %v505_v10  ;;  %v235_v60 = vmul.f32 %v234_v58, %v503_v9 }
 0x317   :  { %244 = vrot.lane.b32.xlu1 %v242_v59, %s474_s0  ;;  %237 = vrot.lane.b32.xlu0 %v235_v60, %s474_s0 }
 0x362   :  { %v254_v7 = vpop.permute.xlu2 %253 }
 0x389   :  { %v238_v61 = vpop.permute.xlu0 %237  ;;  %v245_v63 = vpop.permute.xlu1 %244 }
 0x38a   :  { %v240_v62 = vadd.f32 %v238_v61, %v508_v13  ;;  %v436_v61 = vld [vmem:[%s597_s1 + $0x1a] ss:$0 sm:$0xff] }
 0x38c   :  { %v247_v0 = vadd.f32 %v245_v63, %v240_v62 }
 0x38e   :  { %v248_v1 = vmul.f32 %v247_v0, %v512_v17  ;;  %v437_v0 = vld [vmem:[%s597_s1 + $0x1b] ss:$0 sm:$0xff] }
 0x390   :  { %459 = vtanh.f32 %v248_v1 }
 0x396   :  { %v460_v2 = vpop.eup %459 }
 0x397   :  { %v250_v3 = vmul.f32 %v460_v2, %v512_v17 }
 0x399   :  { %v251_v4 = vadd.f32 %v250_v3, %v515_v21 }
 0x39b   :  { %v258_v5 = vrot.slane %v251_v4, 4  ;;  %v256_v8 = vmul.f32 %v254_v7, %v251_v4 }
 0x39d   :  { %v260_v6 = vmul.f32 %v258_v5, %v251_v4 }
 0x39f   :  { %v262_v11 = vrot.slane %v260_v6, 6 }
 0x3a1   :  { %v264_v12 = vadd.f32 %v262_v11, %v256_v8 }
 0x3a3   :  { %289 = vrot.lane.b32.xlu2 %v264_v12, %s474_s0  ;;  %461 = vtanh.f32 %v264_v12 }
 0x3a9   :  { %v462_v14 = vpop.eup %461 }
 0x3aa   :  { %v267_v15 = vrot.slane %v462_v14, 4 }
 0x3ac   :  { %v269_v16 = vmul.f32 %v267_v15, %v251_v4  ;;  %v438_v4 = vld [vmem:[%s597_s1 + $0x1c] ss:$0 sm:$0xff] }
 0x3ae   :  { %v277_v18 = vperm.slane %v269_v16, 7  ;;  %v270_v19 = vperm.slane %v269_v16, 6 }
 0x3b0   :  { %v278_v20 = vmul.f32 %v277_v18, %v505_v10  ;;  %v271_v22 = vmul.f32 %v270_v19, %v503_v9 }
 0x3b2   :  { %280 = vrot.lane.b32.xlu1 %v278_v20, %s474_s0  ;;  %273 = vrot.lane.b32.xlu0 %v271_v22, %s474_s0 }
 0x3fd   :  { %v290_v33 = vpop.permute.xlu2 %289 }
 0x424   :  { %v274_v23 = vpop.permute.xlu0 %273  ;;  %v281_v25 = vpop.permute.xlu1 %280 }
 0x425   :  { %v276_v24 = vadd.f32 %v274_v23, %v508_v13 }
 0x427   :  { %v283_v26 = vadd.f32 %v281_v25, %v276_v24 }
 0x429   :  { %v284_v27 = vmul.f32 %v283_v26, %v512_v17 }
 0x42b   :  { %463 = vtanh.f32 %v284_v27 }
 0x431   :  { %v464_v28 = vpop.eup %463 }
 0x432   :  { %v286_v29 = vmul.f32 %v464_v28, %v512_v17 }
 0x434   :  { %v287_v30 = vadd.f32 %v286_v29, %v515_v21 }
 0x436   :  { %v294_v31 = vrot.slane %v287_v30, 4  ;;  %v292_v34 = vmul.f32 %v290_v33, %v287_v30 }
 0x438   :  { %v296_v32 = vmul.f32 %v294_v31, %v287_v30 }
 0x43a   :  { %v298_v35 = vrot.slane %v296_v32, 6 }
 0x43c   :  { %v300_v36 = vadd.f32 %v298_v35, %v292_v34 }
 0x43e   :  { %325 = vrot.lane.b32.xlu2 %v300_v36, %s474_s0  ;;  %465 = vtanh.f32 %v300_v36 }
 0x444   :  { %v466_v37 = vpop.eup %465 }
 0x445   :  { %v303_v38 = vrot.slane %v466_v37, 4 }
 0x447   :  { %v305_v39 = vmul.f32 %v303_v38, %v287_v30 }
 0x449   :  { %v313_v40 = vperm.slane %v305_v39, 7  ;;  %v306_v41 = vperm.slane %v305_v39, 6 }
 0x44b   :  { %v314_v42 = vmul.f32 %v313_v40, %v505_v10  ;;  %v307_v43 = vmul.f32 %v306_v41, %v503_v9 }
 0x44d   :  { %316 = vrot.lane.b32.xlu1 %v314_v42, %s474_s0  ;;  %309 = vrot.lane.b32.xlu0 %v307_v43, %s474_s0 }
 0x498   :  { %v326_v9 = vpop.permute.xlu2 %325 }
 0x4bf   :  { %v310_v44 = vpop.permute.xlu0 %309  ;;  %v317_v46 = vpop.permute.xlu1 %316 }
 0x4c0   :  { %v312_v45 = vadd.f32 %v310_v44, %v508_v13 }
 0x4c2   :  { %v319_v47 = vadd.f32 %v317_v46, %v312_v45 }
 0x4c4   :  { %v320_v48 = vmul.f32 %v319_v47, %v512_v17 }
 0x4c6   :  { %467 = vtanh.f32 %v320_v48 }
 0x4cc   :  { %v468_v49 = vpop.eup %467 }
 0x4cd   :  { %v322_v50 = vmul.f32 %v468_v49, %v512_v17  ;;  %v14_v17 = vld [vmem:[%s597_s1 + $0x18] sm:$0x3] }
 0x4ce   :  { %425 = vmatpush.msk.msra.mxu1 %vm385_vm5, %v14_v17 }
 0x4cf   :  { %v323_v51 = vadd.f32 %v322_v50, %v515_v21 }
 0x4d1   :  { %v330_v10 = vrot.slane %v323_v51, 4  ;;  %v328_v53 = vmul.f32 %v326_v9, %v323_v51 }
 0x4d3   :  { %v332_v52 = vmul.f32 %v330_v10, %v323_v51 }
 0x4d5   :  { %v334_v54 = vrot.slane %v332_v52, 6 }
 0x4d7   :  { %v336_v55 = vadd.f32 %v334_v54, %v328_v53 }
 0x4d9   :  { %469 = vtanh.f32 %v336_v55 }
 0x4df   :  { %v470_v56 = vpop.eup %469 }
 0x4e0   :  { %v339_v57 = vrot.slane %v470_v56, 4 }
 0x4e2   :  { %v341_v13 = vmul.f32 %v339_v57, %v323_v51 }
 0x4e4   :  { %v342_v58 = vmax.f32 %v341_v13, 0.0 }
 0x4e6   :  { %v345_v59 = vrot.slane %v342_v58, 6 }
 0x4e8   :  { %346 = vrot.lane.b32.xlu0 %v345_v59, %s475_s17 }
 0x55a   :  { %v347_v21 = vpop.permute.xlu0 %346 }
 0x55b   :  { %349 = vxpose.xlu1.b32.start.end [1/1] (short) (narrow) %v347_v21, 8 }
 0x5ff   :  { %v365_v60 = vpop.trf.xlu1 }
 0x600   :  { %426 = vmatmul.msk.f32.vlgmr.msra.gmra.mxu1 %vm381_vm6, %v365_v60 }
 0x67d   :  { %v406_v62 = vpop.f32.mrf.mxu1 }
 0x67e   :  { %v407_v63 = vadd.f32 %v436_v61, %v406_v62 }
 0x680   :  { %v409_v1 = vmax.f32 %v407_v63, 0.0 }
 0x682   :  { %v411_v2 = vmul.f32 %v437_v0, %v409_v1 }
 0x684   :  { %v412_v3 = vsel %vm385_vm5, %v411_v2, 0.0 }
 0x685   :  { %413 = vadd.xlane.f32.xlu2 %v412_v3 }
 0x6f8   :  { %v414_v5 = vpop.xlane.xlu2 %413 }
 0x6f9   :  { %v416_v6 = vadd.f32 %v438_v4, %v414_v5 }
 0x6fb   :  { %418 = vst.msk [vmem:[%s599_s2] sm:$0x3] %vm417_vm7, %v416_v6 }

</bundles_post_ra>
